<compile_context>
chip_gen: v7x
topology: tpu7x:2x2x1
jax: 0.10.0
libtpu: 0.0.40
codegen_flags: <defaults>
</compile_context>

<pallas_src>
import jax
import jax.numpy as jnp
from jax.experimental import pallas as pl
from jax.experimental.pallas import tpu as pltpu


def linear_self_attn_kernel(x_ref, mask_ref, w_ref, alpha_ref):
    """One batch tile of masked linear self-attention weights.

    x_ref:     (TB, L, H) float (f32 or bf16), VMEM
    mask_ref:  (TB, L)    int32,               VMEM
    w_ref:     (1, 1, H)  float32,             VMEM (grid-resident block)
    alpha_ref: (TB, L)    float32,             VMEM (output)
    """
    x = x_ref[...].astype(jnp.float32)          # upcast in-register (VPU slack)
    w = w_ref[...].astype(jnp.float32)          # (1, 1, H) broadcasts over (TB, L, H)

    # scores = <x, w> along hidden: VPU multiply + lane (XLU) reduce.
    scores = jnp.sum(x * w, axis=-1)            # (TB, L), L on the lane axis

    # masked_fill_(x_mask == 0, -inf)
    scores = jnp.where(mask_ref[...] == 0, -jnp.inf, scores)

    # softmax over the length axis (fully-masked rows -> NaN, as in PyTorch).
    m = jnp.max(scores, axis=-1, keepdims=True)
    e = jnp.exp(scores - m)
    s = jnp.sum(e, axis=-1, keepdims=True)
    # Exact divide: kernel is HBM-bound, the VPU divide is free and keeps
    # rows summing to exactly 1 (PyTorch parity).
    alpha_ref[...] = (e / s).astype(alpha_ref.dtype)


def _ceil_to(n, m):
    return ((n + m - 1) // m) * m


def _padded_block_bytes(tb, L, H, x_itemsize):
    """VMEM bytes of ONE buffer set for a (tb, L, H) batch tile, including
    lane/sublane layout padding (minor dim -> 128, second-minor -> 8)."""
    x_bytes = tb * _ceil_to(L, 8) * _ceil_to(H, 128) * x_itemsize
    mask_bytes = _ceil_to(tb, 8) * _ceil_to(L, 128) * 4     # int32 mask
    alpha_bytes = _ceil_to(tb, 8) * _ceil_to(L, 128) * 4    # f32 output
    return x_bytes + mask_bytes + alpha_bytes


def _weight_resident_bytes(H):
    # (1, 1, H) f32 block, double-buffered by the pipeline, padded to (8, 128k).
    return 2 * 8 * _ceil_to(H, 128) * 4


def _pick_batch_tile(B, L, H, x_itemsize, vmem_budget_bytes):
    """Largest sublane-aligned batch tile whose padded, double-buffered
    working set fits the budget, capped so large batches keep >= ~4 grid
    steps (pipeline overlap on all generations, dual-TC sharding on v7x)."""
    if B <= 8:
        return B  # a block equal to the full batch dim is always legal

    budget = max(0, vmem_budget_bytes - _weight_resident_bytes(H))

    def fits(tb):
        return 2 * _padded_block_bytes(tb, L, H, x_itemsize) <= budget

    # Keep at least ~4 grid steps when the batch is big enough.
    cap = B if B < 16 else max(8, (pl.cdiv(B, 4) // 8) * 8)

    tb = cap
    while tb > 8 and not fits(tb):
        tb = max(8, ((tb - 1) // 8) * 8) if tb % 8 else tb - 8
    # If even 8 rows do not fit, keep 8; the wrapper raises vmem_limit_bytes
    # to cover that block (see TODO above for the H-tiled fallback).
    return tb


def linear_self_attn(x, x_mask, w, b=None, *, batch_tile=None,
                     vmem_budget_bytes=40 * 1024 * 1024):
    """x (B,L,H) float, x_mask (B,L) int/bool, w (H,1) float -> alpha (B,L) f32.

    `b` (the nn.Linear bias) is accepted for API parity but ignored: softmax
    over dim=1 is invariant to a per-row constant shift.
    """
    del b
    B, L, H = x.shape

    if x_mask.dtype == jnp.bool_:
        x_mask = x_mask.astype(jnp.int32)
    w_row = w.reshape(1, 1, H).astype(jnp.float32)

    TB = batch_tile if batch_tile is not None else _pick_batch_tile(
        B, L, H, x.dtype.itemsize, vmem_budget_bytes)
    grid = (pl.cdiv(B, TB),)

    # Scoped-VMEM limit sized from the padded working set (+25% headroom),
    # clamped to [32 MiB, 60 MiB]: above v5e's ~16 MiB default, below v7x's
    # 64 MiB physical VMEM per TensorCore.
    working_set = (2 * _padded_block_bytes(TB, L, H, x.dtype.itemsize)
                   + _weight_resident_bytes(H))
    vmem_limit = int(min(60 * 1024 * 1024,
                         max(32 * 1024 * 1024, working_set * 5 // 4)))

    cost = pl.CostEstimate(
        flops=2 * B * L * H + 5 * B * L,
        transcendentals=B * L,
        bytes_accessed=(B * L * H * x.dtype.itemsize      # x read (dominant)
                        + B * L * 4                        # mask read
                        + B * L * 4                        # alpha write
                        + H * 4),                          # weight read
    )

    return pl.pallas_call(
        linear_self_attn_kernel,
        out_shape=jax.ShapeDtypeStruct((B, L), jnp.float32),
        grid_spec=pltpu.PrefetchScalarGridSpec(
            num_scalar_prefetch=0,
            grid=grid,
            in_specs=[
                pl.BlockSpec((TB, L, H), lambda i: (i, 0, 0)),   # x: batch-tiled
                pl.BlockSpec((TB, L), lambda i: (i, 0)),         # mask
                pl.BlockSpec((1, 1, H), lambda i: (0, 0, 0)),    # weight (resident)
            ],
            out_specs=pl.BlockSpec((TB, L), lambda i: (i, 0)),
        ),
        compiler_params=pltpu.CompilerParams(
            # rows are independent -> shard batch tiles across v7x's 2 TCs
            dimension_semantics=("parallel",),
            vmem_limit_bytes=vmem_limit,
        ),
        cost_estimate=cost,
    )(x, x_mask, w_row)


def reference(x, x_mask, w, b):
    scores = jnp.einsum("blh,ho->bl", x.astype(jnp.float32),
                        w.astype(jnp.float32)) + b[0]
    scores = jnp.where(x_mask == 0, -jnp.inf, scores)
    return jax.nn.softmax(scores, axis=1)


if __name__ == "__main__":
    batch, seq, hidden = 2, 8, 32

    key = jax.random.PRNGKey(0)
    kx, kw, kb = jax.random.split(key, 3)

    # Deterministic inputs.
    x = jax.random.normal(kx, (batch, seq, hidden), dtype=jnp.float32)

    # Mask: nonzero = valid. Pad out the tail of each sequence differently.
    x_mask = jnp.array(
        [[1, 1, 1, 1, 1, 1, 0, 0],
         [1, 1, 1, 1, 1, 1, 1, 1]],
        dtype=jnp.int32,
    )

    # nn.Linear(hidden, 1) init: U(-1/sqrt(H), 1/sqrt(H)) for weight and bias.
    bound = 1.0 / (hidden ** 0.5)
    w = jax.random.uniform(kw, (hidden, 1), jnp.float32, -bound, bound)
    b = jax.random.uniform(kb, (1,), jnp.float32, -bound, bound)

    alpha = jax.block_until_ready(linear_self_attn(x, x_mask, w, b))
    ref = reference(x, x_mask, w, b)

    assert alpha.shape == (batch, seq)
    # Exact softmax divide -> tight agreement with the XLA reference.
    assert jnp.allclose(alpha, ref, atol=1e-4, rtol=1e-4), (alpha, ref)
    # Rows sum to 1 over the length axis.
    assert jnp.allclose(jnp.sum(alpha, axis=1), jnp.ones((batch,)), atol=1e-4)
    # Masked positions got zero weight.
    assert jnp.allclose(alpha[0, 6:], jnp.zeros((2,)), atol=1e-7)

    print("KERNEL_OK")
</pallas_src>

<mosaic_0001>
module attributes {stable_mosaic.version = 11 : i64} {
  func.func @linear_self_attn_kernel(%arg0: i32, %arg1: memref<2x8x32xf32, #tpu.memory_space<vmem>>, %arg2: memref<2x8xi32, #tpu.memory_space<vmem>>, %arg3: memref<1x1x32xf32, #tpu.memory_space<vmem>>, %arg4: memref<2x8xf32, #tpu.memory_space<vmem>>) attributes {dimension_semantics = [#tpu.dimension_semantics<parallel>], iteration_bounds = array<i64: 1>, scalar_prefetch = 0 : i64, scratch_operands = 0 : i64, tpu.core_type = #tpu.core_type<tc>, window_params = [{transform_indices = @transform_0, window_bounds = array<i64: 2, 8, 32>}, {transform_indices = @transform_1, window_bounds = array<i64: 2, 8>}, {pipeline_mode = #tpu.pipeline_mode<synchronous>, transform_indices = @transform_2, window_bounds = array<i64: 1, 1, 32>}, {transform_indices = @transform_3, window_bounds = array<i64: 2, 8>}]} {
    %c0 = arith.constant 0 : index
    %c0_0 = arith.constant 0 : index
    %c0_1 = arith.constant 0 : index
    %0 = vector.load %arg1[%c0, %c0_0, %c0_1] : memref<2x8x32xf32, #tpu.memory_space<vmem>>, vector<2x8x32xf32>
    %c0_2 = arith.constant 0 : index
    %c0_3 = arith.constant 0 : index
    %c0_4 = arith.constant 0 : index
    %1 = vector.load %arg3[%c0_2, %c0_3, %c0_4] : memref<1x1x32xf32, #tpu.memory_space<vmem>>, vector<1x1x32xf32>
    %2 = vector.broadcast %1 : vector<1x1x32xf32> to vector<2x8x32xf32>
    %3 = arith.mulf %0, %2 : vector<2x8x32xf32>
    %cst = arith.constant dense<0.000000e+00> : vector<2x8xf32>
    %4 = vector.multi_reduction <add>, %3, %cst [2] : vector<2x8x32xf32> to vector<2x8xf32>
    %c0_5 = arith.constant 0 : index
    %c0_6 = arith.constant 0 : index
    %5 = vector.load %arg2[%c0_5, %c0_6] : memref<2x8xi32, #tpu.memory_space<vmem>>, vector<2x8xi32>
    %c0_i32 = arith.constant 0 : i32
    %6 = vector.broadcast %c0_i32 : i32 to vector<2x8xi32>
    %7 = arith.cmpi eq, %5, %6 : vector<2x8xi32>
    %cst_7 = arith.constant 0xFF800000 : f32
    %8 = vector.broadcast %cst_7 : f32 to vector<2x8xf32>
    %9 = arith.select %7, %8, %4 : vector<2x8xi1>, vector<2x8xf32>
    %cst_8 = arith.constant dense<0xFF800000> : vector<2xf32>
    %10 = vector.multi_reduction <maximumf>, %9, %cst_8 [1] : vector<2x8xf32> to vector<2xf32>
    %11 = vector.shape_cast %10 : vector<2xf32> to vector<2x1xf32>
    %12 = vector.broadcast %11 : vector<2x1xf32> to vector<2x8xf32>
    %13 = arith.subf %9, %12 : vector<2x8xf32>
    %14 = math.exp %13 : vector<2x8xf32>
    %cst_9 = arith.constant dense<0.000000e+00> : vector<2xf32>
    %15 = vector.multi_reduction <add>, %14, %cst_9 [1] : vector<2x8xf32> to vector<2xf32>
    %16 = vector.shape_cast %15 : vector<2xf32> to vector<2x1xf32>
    %17 = vector.broadcast %16 : vector<2x1xf32> to vector<2x8xf32>
    %18 = arith.divf %14, %17 : vector<2x8xf32>
    %c0_10 = arith.constant 0 : index
    %c0_11 = arith.constant 0 : index
    %19 = vector.load %arg4[%c0_10, %c0_11] : memref<2x8xf32, #tpu.memory_space<vmem>>, vector<2x8xf32>
    tpu.vector_store %arg4[%c0_10, %c0_11], %18 {strides = array<i32>} : memref<2x8xf32, #tpu.memory_space<vmem>>, vector<2x8xf32>,
    return
  }
  func.func @transform_0(%arg0: i32) -> (i32, i32, i32) {
    %c0_i32 = arith.constant 0 : i32
    %c0_i32_0 = arith.constant 0 : i32
    %c0_i32_1 = arith.constant 0 : i32
    return %arg0, %c0_i32, %c0_i32_0 : i32, i32, i32
  }
  func.func @transform_1(%arg0: i32) -> (i32, i32) {
    %c0_i32 = arith.constant 0 : i32
    %c0_i32_0 = arith.constant 0 : i32
    return %arg0, %c0_i32 : i32, i32
  }
  func.func @transform_2(%arg0: i32) -> (i32, i32, i32) {
    %c0_i32 = arith.constant 0 : i32
    %c0_i32_0 = arith.constant 0 : i32
    %c0_i32_1 = arith.constant 0 : i32
    %c0_i32_2 = arith.constant 0 : i32
    return %c0_i32, %c0_i32_0, %c0_i32_1 : i32, i32, i32
  }
  func.func @transform_3(%arg0: i32) -> (i32, i32) {
    %c0_i32 = arith.constant 0 : i32
    %c0_i32_0 = arith.constant 0 : i32
    return %arg0, %c0_i32 : i32, i32
  }
}

</mosaic_0001>

<bundles_post_ra>
// kernel: tpu_custom_call.1
= control target key start
LH: loop header
LB: loop body
LE: loop exit
PB: predicated region body
PF: predicated region fallthrough
CT: control target
= control target key end

     0   :  { %8 = vsyncpa [#allocation3], 0  ;;  %s207_s0 = inlined_call_operand.hbm [shape: f32[2,8,32], index: 0, kind: input, shape index: {}]   ;;  %s208_s1 = inlined_call_operand.vmem [shape: s32[2,8], index: 1, kind: input, shape index: {}]   ;;  %s209_s2 = inlined_call_operand.vmem [shape: f32[1,1,32], index: 2, kind: input, shape index: {}]   ;;  %s210_s3 = inlined_call_operand.hbm [shape: f32[2,8], index: 3, kind: output, shape index: {}]  }
   0x1   :  { %9 = vsyncpa [#allocation4], 0  ;;  %s150_s12 = smov [#allocation2]   ;;  %s102_s16 = scalar_lea.hbm %s207_s0, 256 }
   0x2   :  { %s15_s13 = sshll.u32 %s150_s12, 4  ;;  %p103_p0 = scmp.ne.s32.totalorder %s207_s0, %s102_s16  ;;  %s16_s13 = int_to_ptr.vmem [resolvable:$true] %s15_s13 }
   0x3   :  { %p106_p1 = scmp.lt.u32.totalorder %s102_s16, %s207_s0 }
   0x5   :  { %p108_p2 = pnand %p106_p1, %p103_p0 }
   0x7   :  { %111 = shalt.err (!%p108_p2)
}
   0x8   :  { %s112_s21 = scalar_lea.vmem %s16_s13, 256  ;;  %p117_p4 = scmp.lt.s32.totalorder %s16_s13, %s16_s13 }
   0x9   :  { %p113_p3 = scmp.ne.s32.totalorder %s16_s13, %s112_s21  ;;  %p118_p5 = scmp.lt.s32.totalorder %s112_s21, %s112_s21 }
   0xb   :  { %p119_p6 = por %p118_p5, %p117_p4 }
   0xd   :  { %p120_p7 = pnand %p119_p6, %p113_p3 }
   0xf   :  { %123 = shalt.err (!%p120_p7)
}
  0x10   :  { %s151_s22 = smov 128   ;;  %s152_s23 = smov 8  }
  0x11   :  { %21 = dma.hbm_to_vmem [thread:$0]  %s207_s0, 256, %s16_s13, [#allocation3], %s151_s22, %s151_s22, %s152_s23  }
  0x12   :  { %146 = dma.done.wait [#allocation3], 256  }
  0x13   :  { %147 = vsyncadd [#allocation3], 4294967040  ;;  %v29_v0 = vld [vmem:[#allocation2] sm:$0xff]  ;;  %vm40_vm0 = vcmask 261120   ;;  %v30_v2 = vld [vmem:[#allocation2 + $0x8] sm:$0xff]  ;;  %v51_v7 = vlaneseq  ;;  %vm61_vm1 = vcmask 1041409  }
  0x14   :  { %v93_v1 = vld [vmem:[%s209_s2] ss:$0 sm:$0xff]  ;;  %vm65_vm3 = vcmask 58368  }
  0x15   :  { %v38_v3 = vmul.f32 %v93_v1, %v29_v0  ;;  %v39_v4 = vmul.f32 %v93_v1, %v30_v2  ;;  %v52_v8 = vand.u32 127, %v51_v7  ;;  %v54_v9 = vshrl.u32 %v51_v7, 7  ;;  %v47_v12 = vld [vmem:[%s208_s1] sm:$0x3]  ;;  %s153_s1 = smov [#allocation5]  }
  0x16   :  { %vm48_vm2 = vcmp.eq.s32.totalorder %v47_v12, 0  ;;  %s84_s2 = sshll.u32 %s153_s1, 4  ;;  %s85_s2 = int_to_ptr.vmem [resolvable:$true] %s84_s2 }
  0x17   :  { %v41_v5 = vsel %vm40_vm0, %v38_v3, 0.0  ;;  %v44_v6 = vsel %vm40_vm0, %v39_v4, 0.0  ;;  %v55_v11 = vsub.s32 %v52_v8, %v54_v9  ;;  %s124_s29 = scalar_lea.vmem %s85_s2, 32  ;;  %p129_p9 = scmp.lt.s32.totalorder %s85_s2, %s85_s2 }
  0x18   :  { %42 = vadd.xlane.f32.xlu0 %v41_v5  ;;  %p125_p8 = scmp.ne.s32.totalorder %s85_s2, %s124_s29  ;;  %p130_p10 = scmp.lt.s32.totalorder %s124_s29, %s124_s29 }
  0x1a   :  { %p131_p11 = por %p130_p10, %p129_p9 }
  0x1c   :  { %45 = vadd.xlane.f32.xlu0 %v44_v6  ;;  %p132_p12 = pnand %p131_p11, %p125_p8 }
  0xa5   :  { %v43_v10 = vpop.xlane.xlu0 %42 }
  0xa6   :  { %v56_v14 = vrot.slane %v43_v10, %v55_v11 }
  0xa9   :  { %v46_v13 = vpop.xlane.xlu0 %45 }
  0xaa   :  { %v60_v15 = vrot.slane %v46_v13, %v55_v11 }
  0xac   :  { %v62_v16 = vsel %vm61_vm1, %v60_v15, %v56_v14 }
  0xad   :  { %v64_v17 = vsel %vm48_vm2, -inf, %v62_v16 }
  0xae   :  { %v66_v18 = vsel %vm65_vm3, %v64_v17, -inf }
  0xaf   :  { %67 = vmax.xlane.f32.xlu1 %v66_v18 }
 0x13c   :  { %v68_v19 = vpop.xlane.xlu1 %67 }
 0x13d   :  { %v69_v20 = vsub.f32 %v64_v17, %v68_v19 }
 0x13f   :  { %v70_v21 = vmul.f32 1.442695, %v69_v20 }
 0x141   :  { %98 = vpow2.f32 %v70_v21 }
 0x14b   :  { %v99_v22 = vpop.eup %98 }
 0x14c   :  { %v72_v23 = vsel %vm65_vm3, %v99_v22, 0.0 }
 0x14d   :  { %73 = vadd.xlane.f32.xlu1 %v72_v23 }
 0x1da   :  { %v74_v24 = vpop.xlane.xlu1 %73 }
 0x1db   :  { %100 = vrcp.f32 %v74_v24 }
 0x1e5   :  { %v101_v25 = vpop.eup %100 }
 0x1e6   :  { %v76_v26 = vmul.f32 %v101_v25, %v99_v22 }
 0x1e8   :  { %77 = vst.msk [vmem:[#allocation5] sm:$0x3] %vm65_vm3, %v76_v26 }
 0x1e9   :  { %135 = shalt.err (!%p132_p12)
}
 0x1ea   :  { %s136_s5 = scalar_lea.hbm %s210_s3, 32 }
 0x1eb   :  { %p137_p13 = scmp.ne.s32.totalorder %s210_s3, %s136_s5  ;;  %p140_p0 = scmp.lt.u32.totalorder %s136_s5, %s210_s3 }
 0x1ed   :  { %p142_p1 = pnand %p140_p0, %p137_p13 }
 0x1ef   :  { %145 = shalt.err (!%p142_p1)
}
 0x1f0   :  { %87 = dma.vmem_to_hbm [thread:$0]  %s85_s2, 32, %s210_s3, [#allocation4]  }
 0x1f1   :  { %148 = dma.done.wait [#allocation4], 32  }
 0x1f2   :  { %149 = vsyncadd [#allocation4], 4294967264 }
 0x1f3   :  { %91 = vsyncpa [#allocation3], 1 }
 0x1f4   :  { %92 = vsyncpa [#allocation4], 1 }

</bundles_post_ra>
